<compile_context>
chip_gen: v5e
topology: v5e:2x2
jax: 0.10.0
libtpu: 0.0.40
codegen_flags: <defaults>
</compile_context>

<pallas_src>
import jax
import jax.numpy as jnp
from jax import lax
from jax.experimental import pallas as pl
from jax.experimental.pallas import tpu as pltpu

MAX_ITER = 50
TOL = 1e-4
TOL2 = TOL * TOL

LANE = 128     # lane (last-dim) tile
SUBLANE = 8    # sublane (second-to-last dim) tile

# Contract the last dim of both operands: z (B,F) . w (F,F)  ==  z @ w.T
_DOT_T = (((1,), (1,)), ((), ()))


def tanh_fixed_point_kernel(x_ref, w_ref, o_ref):
    x = x_ref[...]
    w = w_ref[...]  # nn.Linear weight layout (row = output feature)

    # Iteration 1 done analytically: z0 == 0 => W z0 == 0 exactly, so
    # z1 = tanh(x) and err1^2 = ||z1 - 0||^2.  Skips the useless zero matmul.
    z1 = jnp.tanh(x)
    err2_1 = jnp.sum(z1 * z1)

    def cond(carry):
        it, err2_lag, _, _ = carry
        # Same rule as the PyTorch loop but on squared error
        # (sqrt is monotone: err >= tol  <=>  err^2 >= tol^2).
        return jnp.logical_and(it < MAX_ITER, err2_lag >= TOL2)

    def body(carry):
        it, _, z_prev, z = carry
        # MXU + EUP: next fixed-point iterate (z @ W.T + x, then tanh).
        z_next = jnp.tanh(
            lax.dot_general(z, w, _DOT_T, preferred_element_type=jnp.float32) + x
        )
        # XLU: squared error of the transition completed on the PREVIOUS step
        # (z_prev -> z).  It only depends on values live at loop entry, so the
        # cross-lane reduce overlaps this step's matmul instead of sitting on
        # the serial dependency chain of every iteration.
        d = z - z_prev
        err2 = jnp.sum(d * d)
        return it + 1, err2, z, z_next

    init = (jnp.int32(1), err2_1, jnp.zeros_like(x), z1)
    _, _, _, z = lax.while_loop(cond, body, init)
    o_ref[...] = z.astype(o_ref.dtype)


def _tanh_fixed_point_impl(x, w):
    """x: (B, F) float32; w: (F, F) float32 (nn.Linear weight, bias=False)."""
    B, F = x.shape
    assert w.shape == (F, F)

    # Pad to TPU-native tiles: lanes (last dim) -> multiple of 128,
    # sublanes (batch) -> multiple of 8.  Zero padding is exact (see header).
    Bp = ((B + SUBLANE - 1) // SUBLANE) * SUBLANE
    Fp = ((F + LANE - 1) // LANE) * LANE
    if (Bp, Fp) != (B, F):
        x_p = jnp.zeros((Bp, Fp), x.dtype).at[:B, :F].set(x)
    else:
        x_p = x
    if Fp != F:
        w_p = jnp.zeros((Fp, Fp), w.dtype).at[:F, :F].set(w)
    else:
        w_p = w

    cost = pl.CostEstimate(
        flops=2 * Bp * Fp * Fp * MAX_ITER,
        transcendentals=Bp * Fp * MAX_ITER,
        bytes_accessed=(2 * Bp * Fp + Fp * Fp) * 4,
    )

    out_p = pl.pallas_call(
        tanh_fixed_point_kernel,
        out_shape=jax.ShapeDtypeStruct((Bp, Fp), x.dtype),
        grid=(1,),
        in_specs=[
            pl.BlockSpec((Bp, Fp), lambda i: (0, 0)),
            pl.BlockSpec((Fp, Fp), lambda i: (0, 0)),
        ],
        out_specs=pl.BlockSpec((Bp, Fp), lambda i: (0, 0)),
        compiler_params=pltpu.CompilerParams(
            dimension_semantics=("arbitrary",),
        ),
        cost_estimate=cost,
    )(x_p, w_p)
    return out_p[:B, :F]


# Jit the wrapper so the pad/unpad plumbing fuses with the pallas call.
tanh_fixed_point = jax.jit(_tanh_fixed_point_impl)


def _reference(x, w):
    """Pure-JAX reference with exact PyTorch forward-loop semantics."""
    z = jnp.zeros_like(x)
    for _ in range(MAX_ITER):
        z_next = jnp.tanh(z @ w.T + x)
        err = float(jnp.linalg.norm(z - z_next))
        z = z_next
        if err < TOL:
            break
    return z


if __name__ == "__main__":
    B, F = 8, 32  # small shapes: batch=8, out_features=32
    key = jax.random.PRNGKey(0)
    kx, kw = jax.random.split(key)

    x = jax.random.normal(kx, (B, F), dtype=jnp.float32)
    # Deterministic init mimicking nn.Linear default: U(-1/sqrt(F), 1/sqrt(F)).
    bound = 1.0 / jnp.sqrt(jnp.float32(F))
    w = jax.random.uniform(kw, (F, F), minval=-bound, maxval=bound,
                           dtype=jnp.float32)

    out = jax.block_until_ready(tanh_fixed_point(x, w))
    ref = _reference(x, w)

    assert out.shape == (B, F) and out.dtype == jnp.float32
    max_err = float(jnp.max(jnp.abs(out - ref)))
    # The overlapped (lagged) convergence check may refine one extra step past
    # the PyTorch break point; that step moves z by < TOL, so allow small slack.
    assert max_err < 2e-4, f"mismatch vs reference: {max_err}"
    print("KERNEL_OK")
</pallas_src>

<mosaic_0001>
module attributes {stable_mosaic.version = 11 : i64} {
  func.func @tanh_fixed_point_kernel(%arg0: i32, %arg1: memref<8x128xf32, #tpu.memory_space<vmem>>, %arg2: memref<128x128xf32, #tpu.memory_space<vmem>>, %arg3: memref<8x128xf32, #tpu.memory_space<vmem>>) attributes {dimension_semantics = [#tpu.dimension_semantics<arbitrary>], iteration_bounds = array<i64: 1>, scalar_prefetch = 0 : i64, scratch_operands = 0 : i64, tpu.core_type = #tpu.core_type<tc>, window_params = [{pipeline_mode = #tpu.pipeline_mode<synchronous>, transform_indices = @transform_0, window_bounds = array<i64: 8, 128>}, {pipeline_mode = #tpu.pipeline_mode<synchronous>, transform_indices = @transform_1, window_bounds = array<i64: 128, 128>}, {pipeline_mode = #tpu.pipeline_mode<synchronous>, transform_indices = @transform_2, window_bounds = array<i64: 8, 128>}]} {
    %c0 = arith.constant 0 : index
    %c0_0 = arith.constant 0 : index
    %0 = vector.load %arg1[%c0, %c0_0] : memref<8x128xf32, #tpu.memory_space<vmem>>, vector<8x128xf32>
    %c0_1 = arith.constant 0 : index
    %c0_2 = arith.constant 0 : index
    %1 = vector.load %arg2[%c0_1, %c0_2] : memref<128x128xf32, #tpu.memory_space<vmem>>, vector<128x128xf32>
    %2 = math.tanh %0 : vector<8x128xf32>
    %3 = arith.mulf %2, %2 : vector<8x128xf32>
    %4 = vector.shape_cast %3 : vector<8x128xf32> to vector<1x8x128xf32>
    %cst = arith.constant dense<0.000000e+00> : vector<1xf32>
    %5 = vector.multi_reduction <add>, %4, %cst [1, 2] : vector<1x8x128xf32> to vector<1xf32>
    %6 = vector.shape_cast %5 : vector<1xf32> to vector<1x1x1xf32>
    %7 = vector.extract %6[0, 0, 0] : f32 from vector<1x1x1xf32>
    %cst_3 = arith.constant 0.000000e+00 : f32
    %8 = vector.broadcast %cst_3 : f32 to vector<8x128xf32>
    %c1_i32 = arith.constant 1 : i32
    %9:4 = scf.while (%arg4 = %c1_i32, %arg5 = %7, %arg6 = %8, %arg7 = %2) : (i32, f32, vector<8x128xf32>, vector<8x128xf32>) -> (i32, f32, vector<8x128xf32>, vector<8x128xf32>) {
      %c50_i32 = arith.constant 50 : i32
      %11 = arith.cmpi slt, %arg4, %c50_i32 : i32
      %cst_6 = arith.constant 9.99999993E-9 : f32
      %12 = arith.cmpf oge, %arg5, %cst_6 : f32
      %13 = arith.andi %11, %12 : i1
      scf.condition(%13) %arg4, %arg5, %arg6, %arg7 : i32, f32, vector<8x128xf32>, vector<8x128xf32>
    } do {
    ^bb0(%arg4: i32, %arg5: f32, %arg6: vector<8x128xf32>, %arg7: vector<8x128xf32>):
      %cst_6 = arith.constant dense<0.000000e+00> : vector<8x128xf32>
      %11 = tpu.matmul %arg7, %1, %cst_6 {dimension_numbers = #tpu.dot_dimension_numbers<[1], [1], [0], [0], [0, 0, 1, 0], [], []>} : vector<8x128xf32>, vector<128x128xf32>, vector<8x128xf32> -> vector<8x128xf32>
      %12 = arith.addf %11, %0 : vector<8x128xf32>
      %13 = math.tanh %12 : vector<8x128xf32>
      %14 = arith.subf %arg7, %arg6 : vector<8x128xf32>
      %15 = arith.mulf %14, %14 : vector<8x128xf32>
      %16 = vector.shape_cast %15 : vector<8x128xf32> to vector<1x8x128xf32>
      %cst_7 = arith.constant dense<0.000000e+00> : vector<1xf32>
      %17 = vector.multi_reduction <add>, %16, %cst_7 [1, 2] : vector<1x8x128xf32> to vector<1xf32>
      %18 = vector.shape_cast %17 : vector<1xf32> to vector<1x1x1xf32>
      %19 = vector.extract %18[0, 0, 0] : f32 from vector<1x1x1xf32>
      %c1_i32_8 = arith.constant 1 : i32
      %20 = arith.addi %arg4, %c1_i32_8 : i32
      scf.yield %20, %19, %arg7, %13 : i32, f32, vector<8x128xf32>, vector<8x128xf32>
    }
    %c0_4 = arith.constant 0 : index
    %c0_5 = arith.constant 0 : index
    %10 = vector.load %arg3[%c0_4, %c0_5] : memref<8x128xf32, #tpu.memory_space<vmem>>, vector<8x128xf32>
    tpu.vector_store %arg3[%c0_4, %c0_5], %9#3 {strides = array<i32>} : memref<8x128xf32, #tpu.memory_space<vmem>>, vector<8x128xf32>,
    return
  }
  func.func @transform_0(%arg0: i32) -> (i32, i32) {
    %c0_i32 = arith.constant 0 : i32
    %c0_i32_0 = arith.constant 0 : i32
    %c0_i32_1 = arith.constant 0 : i32
    return %c0_i32, %c0_i32_0 : i32, i32
  }
  func.func @transform_1(%arg0: i32) -> (i32, i32) {
    %c0_i32 = arith.constant 0 : i32
    %c0_i32_0 = arith.constant 0 : i32
    %c0_i32_1 = arith.constant 0 : i32
    return %c0_i32, %c0_i32_0 : i32, i32
  }
  func.func @transform_2(%arg0: i32) -> (i32, i32) {
    %c0_i32 = arith.constant 0 : i32
    %c0_i32_0 = arith.constant 0 : i32
    %c0_i32_1 = arith.constant 0 : i32
    return %c0_i32, %c0_i32_0 : i32, i32
  }
}

</mosaic_0001>

<bundles_post_ra>
// kernel: _tanh_fixed_point_impl.1
= control target key start
LH: loop header
LB: loop body
LE: loop exit
PB: predicated region body
PF: predicated region fallthrough
CT: control target
= control target key end

     0   :  { %7 = vsyncpa [#allocation3], 0  ;;  %s345_s0 = inlined_call_operand.vmem [shape: f32[8,128], index: 0, kind: input, shape index: {}]   ;;  %s346_s1 = inlined_call_operand.vmem [shape: f32[128,128], index: 1, kind: input, shape index: {}]   ;;  %s347_s2 = inlined_call_operand.hbm [shape: f32[8,128], index: 2, kind: output, shape index: {}]  }
   0x1   :  { %v234_v0 = vld [vmem:[%s345_s0] sm:$0xff]  ;;  %v244_v2 = vld [vmem:[%s346_s1 + $0x8] sm:$0xff]  ;;  %v249_v3 = vld [vmem:[%s346_s1 + $0x10] sm:$0xff] }
   0x2   :  { %v239_v1 = vld [vmem:[%s346_s1] sm:$0xff]  ;;  %v254_v4 = vld [vmem:[%s346_s1 + $0x18] sm:$0xff]  ;;  %153 = vtanh.f32 %v234_v0  ;;  %v265_v6 = vld [vmem:[%s346_s1 + $0x28] sm:$0xff] }
   0x3   :  { %v260_v5 = vld [vmem:[%s346_s1 + $0x20] sm:$0xff]  ;;  %v270_v7 = vld [vmem:[%s346_s1 + $0x30] sm:$0xff]  ;;  %v275_v8 = vld [vmem:[%s346_s1 + $0x38] sm:$0xff] }
   0x4   :  { %v280_v9 = vld [vmem:[%s346_s1 + $0x40] sm:$0xff]  ;;  %v285_v10 = vld [vmem:[%s346_s1 + $0x48] sm:$0xff]  ;;  %v290_v11 = vld [vmem:[%s346_s1 + $0x50] sm:$0xff] }
   0x5   :  { %v295_v12 = vld [vmem:[%s346_s1 + $0x58] sm:$0xff]  ;;  %v300_v13 = vld [vmem:[%s346_s1 + $0x60] sm:$0xff]  ;;  %v305_v14 = vld [vmem:[%s346_s1 + $0x68] sm:$0xff] }
   0x6   :  { %v310_v15 = vld [vmem:[%s346_s1 + $0x70] sm:$0xff]  ;;  %v315_v16 = vld [vmem:[%s346_s1 + $0x78] sm:$0xff] }
   0x8   :  { %v154_v17 = vpop.eup %153  }
   0x9   :  { %v30_v18 = vmul.f32 %v154_v17, %v154_v17  ;;  %v211_v26 = vmov %v154_v17  }
   0xb   :  { %31 = vadd.xlane.f32.xlu0 %v30_v18 }
  0x7e   :  { %v32_v19 = vpop.xlane.xlu0 %31 }
  0x7f   :  { %v33_v20 = vrot.slane %v32_v19, 4 }
  0x81   :  { %v34_v21 = vadd.f32 %v33_v20, %v32_v19 }
  0x83   :  { %v35_v22 = vrot.slane %v34_v21, 2 }
  0x85   :  { %v36_v23 = vadd.f32 %v35_v22, %v34_v21 }
  0x87   :  { %v37_v24 = vrot.slane %v36_v23, 1 }
  0x89   :  { %v38_v25 = vadd.f32 %v37_v24, %v36_v23 }
  0x8b   :  { %116 = vpush %v38_v25 }
  0xbc   :  { %s117_s14 = spop %116 }
  0xbd   :  { %p106_p0 = scmp.ge.f32.partialorder %s117_s14, 1e-08 }
  0xbe   :  { %v199_v27 = vmov (%p106_p0), %v154_v17   ;;  %v203_v28 = vmov (%p106_p0), 0.0   ;;  %s317_s15 = smov (%p106_p0), 1  }
  0xbf   :  { %108 = sbr.rel (!%p106_p0) target bundleno = 395 (0x18b), region = 29 }
  0xc4 LB: > { %v202_v29 = vmov %v201_v27   ;;  %51 = vmatpush.xpose.msra.mxu0 %v315_v16  ;;  %s83_s15 = sadd.s32 1, %s209_s15   ;;  %s209_s15 = sphi %s317_s15, %s83_s15   ;;  %v205_v28 = vphi %v203_v28, %v204_v28   ;;  %v201_v27 = vphi %v199_v27, %v200_v27  }
  0xc5   : > { %v72_v30 = vsub.f32 %v202_v29, %v205_v28  ;;  %p45_p1 = scmp.lt.s32.totalorder %s83_s15, 50  ;;  %v204_v28 = vmov %v202_v29  }
  0xc7   : > { %v73_v31 = vmul.f32 %v72_v30, %v72_v30 }
  0xc8   : > { %52 = vmatpush.xpose.msra.mxu0 %v310_v15 }
  0xc9   : > { %74 = vadd.xlane.f32.xlu0 %v73_v31 }
  0xcc   : > { %53 = vmatpush.xpose.msra.mxu0 %v305_v14 }
  0xd0   : > { %54 = vmatpush.xpose.msra.mxu0 %v300_v13 }
  0xd4   : > { %55 = vmatpush.xpose.msra.mxu0 %v295_v12 }
  0xd8   : > { %56 = vmatpush.xpose.msra.mxu0 %v290_v11 }
  0xdc   : > { %57 = vmatpush.xpose.msra.mxu0 %v285_v10 }
  0xe0   : > { %58 = vmatpush.xpose.msra.mxu0 %v280_v9 }
  0xe4   : > { %59 = vmatpush.xpose.msra.mxu0 %v275_v8 }
  0xe8   : > { %60 = vmatpush.xpose.msra.mxu0 %v270_v7 }
  0xec   : > { %61 = vmatpush.xpose.msra.mxu0 %v265_v6 }
  0xf0   : > { %62 = vmatpush.xpose.msra.mxu0 %v260_v5 }
  0xf4   : > { %63 = vmatpush.xpose.msra.mxu0 %v254_v4 }
  0xf8   : > { %64 = vmatpush.xpose.msra.mxu0 %v249_v3 }
  0xfc   : > { %65 = vmatpush.xpose.msra.mxu0 %v244_v2 }
 0x100   : > { %66 = vmatpush.xpose.msra.mxu0 %v239_v1 }
 0x103   : > { %67 = vmatmul.f32.vlgmr.msra.gmra.mxu0 %v202_v29 }
 0x13c   : > { %v75_v32 = vpop.xlane.xlu0 %74 }
 0x13d   : > { %v76_v33 = vrot.slane %v75_v32, 4 }
 0x13f   : > { %v77_v34 = vadd.f32 %v76_v33, %v75_v32 }
 0x141   : > { %v78_v35 = vrot.slane %v77_v34, 2 }
 0x143   : > { %v79_v36 = vadd.f32 %v78_v35, %v77_v34 }
 0x145   : > { %v80_v37 = vrot.slane %v79_v36, 1 }
 0x147   : > { %v81_v38 = vadd.f32 %v80_v37, %v79_v36 }
 0x149   : > { %118 = vpush %v81_v38 }
 0x17a   : > { %s119_s1 = spop %118 }
 0x17b   : > { %p46_p2 = scmp.ge.f32.partialorder %s119_s1, 1e-08 }
 0x17d   : > { %p47_p3 = pnand %p46_p2, %p45_p1 }
 0x180   : > { %v68_v39 = vpop.f32.mrf.mxu0 }
 0x181   : > { %v69_v40 = vadd.f32 %v68_v39, %v234_v0 }
 0x183   : > { %155 = vtanh.f32 %v69_v40 }
 0x186   :  { %50 = sbr.rel (!%p47_p3) target bundleno = 196 (0xc4), region = 35 }
 0x189   : > { %v156_v41 = vpop.eup %155  }
 0x18a   : > { %v200_v27 = vmov %v156_v41   ;;  %v212_v26 = vmov (%p47_p3), %v156_v41  }
 0x18b PF:  { %84 = vst [vmem:[#allocation2] sm:$0xff] %v213_v26  ;;  %s92_s18 = sshll.u32 %s347_s2, 4  ;;  %s215_s0 = smov [#allocation2]   ;;  %v213_v26 = vphi %v211_v26, %v212_v26   ;;  %s93_s18 = int_to_ptr.hbm [resolvable:$true] %s92_s18 }
 0x18c   :  { %s90_s19 = sshll.u32 %s215_s0, 4  ;;  %s91_s19 = int_to_ptr.vmem [resolvable:$true] %s90_s19 }
 0x18d   :  { %95 = dma.vmem_to_hbm [thread:$0]  %s91_s19, 128, %s93_s18, [#allocation3]  }
 0x18e   :  { %197 = dma.done.wait [#allocation3], 128  }
 0x18f   :  { %198 = vsyncadd [#allocation3], 4294967168 }
 0x190   :  { %100 = vsyncpa [#allocation3], 1 }

</bundles_post_ra>
